<compile_context>
chip_gen: v7x
topology: tpu7x:2x2x1
jax: 0.10.0
libtpu: 0.0.40
codegen_flags: <defaults>
</compile_context>

<pallas_src>
import jax
import jax.numpy as jnp
from jax.experimental import pallas as pl
from jax.experimental.pallas import tpu as pltpu

EPS = 1e-9
TEMP = 0.66       # digit_temp -- only used by the Concrete distribution, not the hot path
NEG_PAD = -1e30   # bias of padded logit lanes: exp(NEG_PAD - max) == 0 exactly in f32
LANE = 128


def _round_up(x, m):
    return ((x + m - 1) // m) * m


def _decoder_b_kernel(z_ref, poe_ref, w1_ref, b1_ref, w2_ref, b2_ref, out_ref):
    """One grid step: (T, Z) latent rows -> (T, DP) lane-dense log-probs."""
    z = z_ref[...]                                        # (T, Z) f32

    # 'poe' rows: torch.pow(z + EPS, 1/3) == exp(log(z + EPS) / 3) for z + EPS > 0.
    # EUP exp/log sit in an otherwise-free VLIW slot; jnp.where is a single vselect
    # and is NaN-safe (unselected cbrt path cannot leak into non-poe rows).
    z_cbrt = jnp.exp(jnp.log(z + EPS) * (1.0 / 3.0))
    z = jnp.where(poe_ref[...] != 0.0, z_cbrt, z)

    # dec_hidden: Linear + ReLU.  bf16 MXU matmul, f32 accumulate, f32 bias/ReLU.
    h = jnp.dot(z.astype(jnp.bfloat16), w1_ref[...],
                preferred_element_type=jnp.float32) + b1_ref[...]
    h = jnp.maximum(h, 0.0)

    # dec_label: Linear padded to LANE output columns (pad weights 0, pad bias NEG_PAD).
    logits = jnp.dot(h.astype(jnp.bfloat16), w2_ref[...],
                     preferred_element_type=jnp.float32) + b2_ref[...]
    # (reference's `+ EPS` before log_softmax is shift-invariant -> omitted)

    # log_softmax over the padded last axis; padded lanes contribute exp(-1e30 - m) = 0.
    m = jnp.max(logits, axis=-1, keepdims=True)
    lse = jnp.log(jnp.sum(jnp.exp(logits - m), axis=-1, keepdims=True)) + m
    out_ref[...] = logits - lse                            # unmasked (T, 128) store


def decoder_b_forward(zShared, poe_flags, labels, params, tile_rows=1024):
    """DecoderB forward for all shared latents in a single Pallas launch.

    zShared   : (L, S, B, Z) float32  stacked Concrete samples, one per shared key
    poe_flags : (L,) int              1 where the latent name contains 'poe'
    labels    : (B, D) float32        one-hot targets (broadcast over S, like
                                      labels.unsqueeze(0) in the PyTorch code)
    params    : dict with w1_bf16 (Z,H), b1 (1,H), w2_pad_bf16 (H,DP), b2_pad (1,DP)
    returns   : (pred_log_probs (L,S,B,D), loss (L,S,B))
    """
    L, S, B, Z = zShared.shape
    H = params["w1_bf16"].shape[1]
    DP = params["w2_pad_bf16"].shape[1]
    D = labels.shape[1]

    LM = L * S * B
    # Row tiling: multiple-of-8 tiles; at small sizes this is a single grid step.
    tile_rows = min(tile_rows, _round_up(LM, 8))
    tile_rows = _round_up(tile_rows, 8)
    LM_pad = _round_up(LM, tile_rows)
    n_tiles = LM_pad // tile_rows

    z2 = zShared.reshape(LM, Z).astype(jnp.float32)
    poe_mask = jnp.repeat(jnp.asarray(poe_flags, jnp.float32), S * B).reshape(LM, 1)
    if LM_pad != LM:
        z2 = jnp.pad(z2, ((0, LM_pad - LM), (0, 0)))
        poe_mask = jnp.pad(poe_mask, ((0, LM_pad - LM), (0, 0)))

    slab = pl.pallas_call(
        _decoder_b_kernel,
        out_shape=jax.ShapeDtypeStruct((LM_pad, DP), jnp.float32),
        grid=(n_tiles,),
        in_specs=[
            pl.BlockSpec((tile_rows, Z), lambda i: (i, 0)),   # latent rows (all L fused)
            pl.BlockSpec((tile_rows, 1), lambda i: (i, 0)),   # per-row poe mask
            pl.BlockSpec((Z, H), lambda i: (0, 0)),           # W1 (bf16, VMEM-resident)
            pl.BlockSpec((1, H), lambda i: (0, 0)),           # b1 (f32)
            pl.BlockSpec((H, DP), lambda i: (0, 0)),          # W2 padded (bf16, resident)
            pl.BlockSpec((1, DP), lambda i: (0, 0)),          # b2 padded (f32)
        ],
        out_specs=pl.BlockSpec((tile_rows, DP), lambda i: (i, 0)),
        compiler_params=pltpu.CompilerParams(
            # Single step at small shapes; row-tile axis only shards across the
            # two v7x TensorCores once each tile carries real matmul work.
            dimension_semantics=("arbitrary",) if n_tiles == 1 else ("parallel",)),
    )(z2, poe_mask, params["w1_bf16"], params["b1"],
      params["w2_pad_bf16"], params["b2_pad"])

    logp = slab[:LM, :D].reshape(L, S, B, D)
    # Train-branch loss -(target * y_pred).sum(-1): tiny reduction, fused by XLA.
    loss = -(labels[None, None] * logp).sum(-1)
    return logp, loss


def _reference_forward(zShared, poe_flags, labels, params):
    """Plain-JAX reference mirroring the kernel's mixed-precision path
    (bf16 MXU matmuls, f32 everything else)."""
    logps, losses = [], []
    for l in range(zShared.shape[0]):
        z = zShared[l]
        if int(poe_flags[l]):
            z = jnp.exp(jnp.log(z + EPS) * (1.0 / 3.0))   # == torch.pow(z + EPS, 1/3)
        h = jnp.einsum("sbz,zh->sbh", z.astype(jnp.bfloat16), params["w1_bf16"],
                       preferred_element_type=jnp.float32) + params["b1"][0]
        h = jax.nn.relu(h)
        logits = jnp.einsum("sbh,hd->sbd", h.astype(jnp.bfloat16), params["w2_bf16"],
                            preferred_element_type=jnp.float32) + params["b2"][0] + EPS
        logp = jax.nn.log_softmax(logits, axis=2)
        logps.append(logp)
        losses.append(-(labels[None] * logp).sum(-1))
    return jnp.stack(logps), jnp.stack(losses)


def init_decoder_b_params(key, zShared_dim, num_hidden, num_digits):
    """Deterministic kaiming-style init (kaiming_normal_ weights, zero bias), stored
    pre-transposed as (in, out).  Matmul weights are additionally stored in bf16, and
    W2/b2 pre-padded to 128 output lanes for the lane-dense kernel store."""
    dp = max(LANE, _round_up(num_digits, LANE))
    k1, k2 = jax.random.split(key)
    w1 = jax.random.normal(k1, (zShared_dim, num_hidden), jnp.float32) * jnp.sqrt(
        2.0 / zShared_dim)
    w2 = jax.random.normal(k2, (num_hidden, num_digits), jnp.float32) * jnp.sqrt(
        2.0 / num_hidden)
    b1 = jnp.zeros((1, num_hidden), jnp.float32)
    b2 = jnp.zeros((1, num_digits), jnp.float32)
    w2_pad = jnp.zeros((num_hidden, dp), jnp.float32).at[:, :num_digits].set(w2)
    b2_pad = jnp.full((1, dp), NEG_PAD, jnp.float32).at[:, :num_digits].set(b2)
    return {
        "w1": w1, "b1": b1, "w2": w2, "b2": b2,
        "w1_bf16": w1.astype(jnp.bfloat16),
        "w2_bf16": w2.astype(jnp.bfloat16),
        "w2_pad_bf16": w2_pad.astype(jnp.bfloat16),
        "b2_pad": b2_pad,
    }


if __name__ == "__main__":
    # Small shapes consistent with the module: zShared_dim = num_digits = 10,
    # num_hidden = 256 (module default), two shared latents ("sharedB", "poe").
    S, B, Z, H, D = 2, 8, 10, 256, 10
    shared_names = ["sharedB", "poe"]
    poe_flags = jnp.array([1 if "poe" in n else 0 for n in shared_names], jnp.int32)
    L = len(shared_names)

    key = jax.random.PRNGKey(0)
    k_params, k_z, k_lab = jax.random.split(key, 3)

    params = init_decoder_b_params(k_params, zShared_dim=Z, num_hidden=H, num_digits=D)

    # Relaxed-one-hot ("Concrete") shared samples (one per shared key) and one-hot labels.
    zShared = jax.nn.softmax(
        jax.random.normal(k_z, (L, S, B, Z), jnp.float32) / TEMP, axis=-1)
    label_idx = jax.random.randint(k_lab, (B,), 0, D)
    labels = jax.nn.one_hot(label_idx, D, dtype=jnp.float32)

    # TODO(synk): probtorch.Trace / p.concrete Concrete-distribution log-prob
    # bookkeeping and the eval-branch accuracy loss (argmax equality) have no
    # Pallas equivalent; only the train-path compute is implemented.
    logp, loss = decoder_b_forward(zShared, poe_flags, labels, params)
    logp, loss = jax.block_until_ready((logp, loss))

    ref_logp, ref_loss = _reference_forward(zShared, poe_flags, labels, params)
    assert jnp.allclose(logp, ref_logp, atol=2e-3, rtol=2e-3), "logp mismatch"
    assert jnp.allclose(loss, ref_loss, atol=2e-3, rtol=2e-3), "loss mismatch"

    results = {"labels_" + n: loss[i] for i, n in enumerate(shared_names)}
    print("KERNEL_OK")
</pallas_src>

<mosaic_0001>
module attributes {stable_mosaic.version = 11 : i64} {
  func.func @_decoder_b_kernel(%arg0: i32, %arg1: memref<32x10xf32, #tpu.memory_space<vmem>>, %arg2: memref<32x1xf32, #tpu.memory_space<vmem>>, %arg3: memref<10x256xbf16, #tpu.memory_space<vmem>>, %arg4: memref<1x256xf32, #tpu.memory_space<vmem>>, %arg5: memref<256x128xbf16, #tpu.memory_space<vmem>>, %arg6: memref<1x128xf32, #tpu.memory_space<vmem>>, %arg7: memref<32x128xf32, #tpu.memory_space<vmem>>) attributes {dimension_semantics = [#tpu.dimension_semantics<arbitrary>], iteration_bounds = array<i64: 1>, scalar_prefetch = 0 : i64, scratch_operands = 0 : i64, tpu.core_type = #tpu.core_type<tc>, window_params = [{transform_indices = @transform_0, window_bounds = array<i64: 32, 10>}, {transform_indices = @transform_1, window_bounds = array<i64: 32, 1>}, {pipeline_mode = #tpu.pipeline_mode<synchronous>, transform_indices = @transform_2, window_bounds = array<i64: 10, 256>}, {pipeline_mode = #tpu.pipeline_mode<synchronous>, transform_indices = @transform_3, window_bounds = array<i64: 1, 256>}, {pipeline_mode = #tpu.pipeline_mode<synchronous>, transform_indices = @transform_4, window_bounds = array<i64: 256, 128>}, {pipeline_mode = #tpu.pipeline_mode<synchronous>, transform_indices = @transform_5, window_bounds = array<i64: 1, 128>}, {transform_indices = @transform_6, window_bounds = array<i64: 32, 128>}]} {
    %c0 = arith.constant 0 : index
    %c0_0 = arith.constant 0 : index
    %0 = vector.load %arg1[%c0, %c0_0] : memref<32x10xf32, #tpu.memory_space<vmem>>, vector<32x10xf32>
    %cst = arith.constant 9.99999971E-10 : f32
    %1 = vector.broadcast %cst : f32 to vector<32x10xf32>
    %2 = arith.addf %0, %1 : vector<32x10xf32>
    %3 = math.log %2 : vector<32x10xf32>
    %cst_1 = arith.constant 0.333333343 : f32
    %4 = vector.broadcast %cst_1 : f32 to vector<32x10xf32>
    %5 = arith.mulf %3, %4 : vector<32x10xf32>
    %6 = math.exp %5 : vector<32x10xf32>
    %c0_2 = arith.constant 0 : index
    %c0_3 = arith.constant 0 : index
    %7 = vector.load %arg2[%c0_2, %c0_3] : memref<32x1xf32, #tpu.memory_space<vmem>>, vector<32x1xf32>
    %cst_4 = arith.constant 0.000000e+00 : f32
    %8 = vector.broadcast %cst_4 : f32 to vector<32x1xf32>
    %9 = arith.cmpf one, %7, %8 : vector<32x1xf32>
    %10 = vector.shape_cast %9 : vector<32x1xi1> to vector<32x1xi1>
    %11 = vector.broadcast %10 : vector<32x1xi1> to vector<32x10xi1>
    %12 = arith.select %11, %6, %0 : vector<32x10xi1>, vector<32x10xf32>
    %13 = arith.truncf %12 : vector<32x10xf32> to vector<32x10xbf16>
    %c0_5 = arith.constant 0 : index
    %c0_6 = arith.constant 0 : index
    %14 = vector.load %arg3[%c0_5, %c0_6] : memref<10x256xbf16, #tpu.memory_space<vmem>>, vector<10x256xbf16>
    %cst_7 = arith.constant dense<0.000000e+00> : vector<32x256xf32>
    %15 = tpu.matmul %13, %14, %cst_7 {dimension_numbers = #tpu.dot_dimension_numbers<[1], [0], [0], [1], [0, 0, 1, 1], [], []>} : vector<32x10xbf16>, vector<10x256xbf16>, vector<32x256xf32> -> vector<32x256xf32>
    %c0_8 = arith.constant 0 : index
    %c0_9 = arith.constant 0 : index
    %16 = vector.load %arg4[%c0_8, %c0_9] : memref<1x256xf32, #tpu.memory_space<vmem>>, vector<1x256xf32>
    %17 = vector.broadcast %16 : vector<1x256xf32> to vector<32x256xf32>
    %18 = arith.addf %15, %17 : vector<32x256xf32>
    %cst_10 = arith.constant 0.000000e+00 : f32
    %19 = vector.broadcast %cst_10 : f32 to vector<32x256xf32>
    %20 = arith.maximumf %18, %19 : vector<32x256xf32>
    %21 = arith.truncf %20 : vector<32x256xf32> to vector<32x256xbf16>
    %c0_11 = arith.constant 0 : index
    %c0_12 = arith.constant 0 : index
    %22 = vector.load %arg5[%c0_11, %c0_12] : memref<256x128xbf16, #tpu.memory_space<vmem>>, vector<256x128xbf16>
    %cst_13 = arith.constant dense<0.000000e+00> : vector<32x128xf32>
    %23 = tpu.matmul %21, %22, %cst_13 {dimension_numbers = #tpu.dot_dimension_numbers<[1], [0], [0], [1], [0, 0, 1, 1], [], []>} : vector<32x256xbf16>, vector<256x128xbf16>, vector<32x128xf32> -> vector<32x128xf32>
    %c0_14 = arith.constant 0 : index
    %c0_15 = arith.constant 0 : index
    %24 = vector.load %arg6[%c0_14, %c0_15] : memref<1x128xf32, #tpu.memory_space<vmem>>, vector<1x128xf32>
    %25 = vector.broadcast %24 : vector<1x128xf32> to vector<32x128xf32>
    %26 = arith.addf %23, %25 : vector<32x128xf32>
    %cst_16 = arith.constant dense<0xFF800000> : vector<32xf32>
    %27 = vector.multi_reduction <maximumf>, %26, %cst_16 [1] : vector<32x128xf32> to vector<32xf32>
    %28 = vector.shape_cast %27 : vector<32xf32> to vector<32x1xf32>
    %29 = vector.broadcast %28 : vector<32x1xf32> to vector<32x128xf32>
    %30 = arith.subf %26, %29 : vector<32x128xf32>
    %31 = math.exp %30 : vector<32x128xf32>
    %cst_17 = arith.constant dense<0.000000e+00> : vector<32xf32>
    %32 = vector.multi_reduction <add>, %31, %cst_17 [1] : vector<32x128xf32> to vector<32xf32>
    %33 = vector.shape_cast %32 : vector<32xf32> to vector<32x1xf32>
    %34 = math.log %33 : vector<32x1xf32>
    %35 = arith.addf %34, %28 : vector<32x1xf32>
    %36 = vector.broadcast %35 : vector<32x1xf32> to vector<32x128xf32>
    %37 = arith.subf %26, %36 : vector<32x128xf32>
    %c0_18 = arith.constant 0 : index
    %c0_19 = arith.constant 0 : index
    %38 = vector.load %arg7[%c0_18, %c0_19] : memref<32x128xf32, #tpu.memory_space<vmem>>, vector<32x128xf32>
    tpu.vector_store %arg7[%c0_18, %c0_19], %37 {strides = array<i32>} : memref<32x128xf32, #tpu.memory_space<vmem>>, vector<32x128xf32>,
    return
  }
  func.func @transform_0(%arg0: i32) -> (i32, i32) {
    %c0_i32 = arith.constant 0 : i32
    %c0_i32_0 = arith.constant 0 : i32
    return %arg0, %c0_i32 : i32, i32
  }
  func.func @transform_1(%arg0: i32) -> (i32, i32) {
    %c0_i32 = arith.constant 0 : i32
    %c0_i32_0 = arith.constant 0 : i32
    return %arg0, %c0_i32 : i32, i32
  }
  func.func @transform_2(%arg0: i32) -> (i32, i32) {
    %c0_i32 = arith.constant 0 : i32
    %c0_i32_0 = arith.constant 0 : i32
    %c0_i32_1 = arith.constant 0 : i32
    return %c0_i32, %c0_i32_0 : i32, i32
  }
  func.func @transform_3(%arg0: i32) -> (i32, i32) {
    %c0_i32 = arith.constant 0 : i32
    %c0_i32_0 = arith.constant 0 : i32
    %c0_i32_1 = arith.constant 0 : i32
    return %c0_i32, %c0_i32_0 : i32, i32
  }
  func.func @transform_4(%arg0: i32) -> (i32, i32) {
    %c0_i32 = arith.constant 0 : i32
    %c0_i32_0 = arith.constant 0 : i32
    %c0_i32_1 = arith.constant 0 : i32
    return %c0_i32, %c0_i32_0 : i32, i32
  }
  func.func @transform_5(%arg0: i32) -> (i32, i32) {
    %c0_i32 = arith.constant 0 : i32
    %c0_i32_0 = arith.constant 0 : i32
    %c0_i32_1 = arith.constant 0 : i32
    return %c0_i32, %c0_i32_0 : i32, i32
  }
  func.func @transform_6(%arg0: i32) -> (i32, i32) {
    %c0_i32 = arith.constant 0 : i32
    %c0_i32_0 = arith.constant 0 : i32
    return %arg0, %c0_i32 : i32, i32
  }
}

</mosaic_0001>

<bundles_post_ra>
// kernel: tpu_custom_call.1
= control target key start
LH: loop header
LB: loop body
LE: loop exit
PB: predicated region body
PF: predicated region fallthrough
CT: control target
= control target key end

     0   :  { %11 = vsyncpa [#allocation3], 0  ;;  %s775_s0 = inlined_call_operand.vmem [shape: f32[32,10], index: 0, kind: input, shape index: {}]   ;;  %s776_s1 = inlined_call_operand.vmem [shape: f32[32,1], index: 1, kind: input, shape index: {}]   ;;  %s777_s2 = inlined_call_operand.vmem [shape: bf16[10,256], index: 2, kind: input, shape index: {}]   ;;  %s778_s3 = inlined_call_operand.vmem [shape: f32[1,256], index: 3, kind: input, shape index: {}]   ;;  %s779_s4 = inlined_call_operand.hbm [shape: bf16[256,128], index: 4, kind: input, shape index: {}]   ;;  %s780_s5 = inlined_call_operand.vmem [shape: f32[1,128], index: 5, kind: input, shape index: {}]   ;;  %s781_s6 = inlined_call_operand.hbm [shape: f32[32,128], index: 6, kind: output, shape index: {}]  }
   0x1   :  { %12 = vsyncpa [#allocation4], 0  ;;  %s625_s21 = smov [#allocation2]   ;;  %s577_s25 = scalar_lea.hbm %s779_s4, 2048 }
   0x2   :  { %s26_s22 = sshll.u32 %s625_s21, 4  ;;  %p578_p0 = scmp.ne.s32.totalorder %s779_s4, %s577_s25  ;;  %s27_s22 = int_to_ptr.vmem [resolvable:$true] %s26_s22 }
   0x3   :  { %p581_p1 = scmp.lt.u32.totalorder %s577_s25, %s779_s4 }
   0x5   :  { %p583_p2 = pnand %p581_p1, %p578_p0 }
   0x7   :  { %586 = shalt.err (!%p583_p2)
}
   0x8   :  { %s587_s30 = scalar_lea.vmem %s27_s22, 2048  ;;  %p592_p4 = scmp.lt.s32.totalorder %s27_s22, %s27_s22 }
   0x9   :  { %p588_p3 = scmp.ne.s32.totalorder %s27_s22, %s587_s30  ;;  %p593_p5 = scmp.lt.s32.totalorder %s587_s30, %s587_s30 }
   0xb   :  { %p594_p6 = por %p593_p5, %p592_p4 }
   0xd   :  { %p595_p7 = pnand %p594_p6, %p588_p3 }
   0xf   :  { %598 = shalt.err (!%p595_p7)
}
  0x10   :  { %s626_s7 = smov 64   ;;  %s627_s8 = smov 4  }
  0x11   :  { %32 = dma.hbm_to_vmem [thread:$0]  %s779_s4, 2048, %s27_s22, [#allocation3], %s626_s7, %s626_s7, %s627_s8  }
  0x12   :  { %621 = dma.done.wait [#allocation3], 2048  }
  0x13   :  { %622 = vsyncadd [#allocation3], 4294965248  ;;  %v628_v0 = vmov 0   ;;  %v67_v1 = vld [vmem:[%s776_s1] sm:$0xff]  ;;  %v69_v2 = vld [vmem:[%s776_s1 + $0x10] sm:$0xff]  ;;  %vm130_vm4 = vcmask 1044480  }
  0x14   :  { %524 = vset.pattern.permute.xlu0 %v628_v0  ;;  %525 = vset.pattern.permute.xlu1 %v628_v0  ;;  %v68_v3 = vld [vmem:[%s776_s1 + $0x8] sm:$0xff]  ;;  %vm71_vm0 = vcmp.ne.f32.partialorder %v67_v1, 0.0  ;;  %vm73_vm1 = vcmp.ne.f32.partialorder %v69_v2, 0.0  ;;  %v70_v4 = vld [vmem:[%s776_s1 + $0x18] sm:$0xff]  ;;  %v529_v12 = vld [vmem:[#allocation2 + $0x40] sm:$0xff]   ;;  %vm123_vm7 = vcmask 80896   ;;  %v105_v2 = vlaneseq }
  0x15   :  { %169 = vmatprep.mubr.bf16.mxu0 %v628_v0  ;;  %vm72_vm2 = vcmp.ne.f32.partialorder %v68_v3, 0.0  ;;  %v75_v5 = vsel %vm71_vm0, 1, %v628_v0  ;;  %v77_v6 = vsel %vm73_vm1, 1, %v628_v0  ;;  %vm74_vm3 = vcmp.ne.f32.partialorder %v70_v4, 0.0  ;;  %v704_v13 = vld [vmem:[#allocation2] sm:$0xff]   ;;  %v706_v14 = vld [vmem:[#allocation2 + $0x48] sm:$0xff]   ;;  %501 = vmatprep.subr.bf16.mxu1 %v529_v12 }
  0x16   :  { %80 = vperm.xlu0 %524, %v75_v5   ;;  %86 = vperm.xlu1 %525, %v77_v6   ;;  %v76_v7 = vsel %vm72_vm2, 1, %v628_v0  ;;  %v78_v8 = vsel %vm74_vm3, 1, %v628_v0  ;;  %v526_v9 = vld [vmem:[%s777_s2 + $0x4] ss:$8 sps:$4 sm:$0x1f]   ;;  %v712_v16 = vld [vmem:[#allocation2 + $0x50] sm:$0xff]  }
  0x17   :  { %v528_v10 = vld [vmem:[%s777_s2] ss:$8 sps:$4 sm:$0x1f]   ;;  %453 = vmatprep.subr.msk.bf16.mxu0 %vm130_vm4, %v526_v9  ;;  %509 = vmatpush3.bf16.msra.mxu1 %v704_v13  ;;  %v716_v17 = vld [vmem:[#allocation2 + $0x10] sm:$0xff]   ;;  %v718_v18 = vld [vmem:[#allocation2 + $0x58] sm:$0xff]   ;;  %v106_v3 = vshrl.u32 %v105_v2, 7 }
  0x18   :  { %v132_v11 = vsel %vm130_vm4, %v528_v10, 0  ;;  %502 = vmatprep.subr.bf16.mxu1 %v706_v14  ;;  %v710_v15 = vld [vmem:[#allocation2 + $0x8] sm:$0xff]   ;;  %v722_v19 = vld [vmem:[#allocation2 + $0x18] sm:$0xff]   ;;  %v724_v20 = vld [vmem:[#allocation2 + $0x60] sm:$0xff]  }
  0x19   :  { %138 = vmatpush1.bf16.msra.mxu0 %v132_v11  ;;  %v728_v21 = vld [vmem:[#allocation2 + $0x20] sm:$0xff]   ;;  %v730_v22 = vld [vmem:[#allocation2 + $0x68] sm:$0xff]   ;;  %v41_v27 = vld [vmem:[%s775_s0 + $0x10] sm:$0xff]  ;;  %v107_v4 = vsub.s32 0, %v106_v3  ;;  %v111_v6 = vsub.s32 1, %v106_v3 }
  0x1a   :  { %83 = vperm.xlu0 %524, %v76_v7   ;;  %89 = vperm.xlu1 %525, %v78_v8   ;;  %v39_v23 = vld [vmem:[%s775_s0] sm:$0xff]  ;;  %v40_v24 = vld [vmem:[%s775_s0 + $0x8] sm:$0xff]  ;;  %v42_v28 = vld [vmem:[%s775_s0 + $0x18] sm:$0xff]  ;;  %v45_v29 = vadd.f32 1e-09, %v41_v27 }
  0x1b   :  { %473 = vmatprep.subr.bf16.mxu0 %v529_v12  ;;  %510 = vmatpush3.bf16.msra.mxu1 %v710_v15  ;;  %v43_v25 = vadd.f32 1e-09, %v39_v23  ;;  %v44_v26 = vadd.f32 1e-09, %v40_v24  ;;  %v46_v30 = vadd.f32 1e-09, %v42_v28 }
  0x1c   :  { %503 = vmatprep.subr.bf16.mxu1 %v712_v16  ;;  %v540_v61 = vld [vmem:[#allocation2 + $0x28] sm:$0xff]   ;;  %v541_v62 = vld [vmem:[#allocation2 + $0x70] sm:$0xff]   ;;  %v544_v1 = vld [vmem:[#allocation2 + $0x38] sm:$0xff]  }
  0x1d   :  { %545 = vlog2.f32 %v43_v25  ;;  %v542_v63 = vld [vmem:[#allocation2 + $0x30] sm:$0xff]   ;;  %v103_v5 = vld [vmem:[%s778_s3] sm:$0x3] }
  0x1e   :  { %547 = vlog2.f32 %v44_v26  ;;  %v108_v7 = vrot.slane %v103_v5, %v107_v4  ;;  %v112_v8 = vrot.slane %v103_v5, %v111_v6 }
  0x1f   :  { %511 = vmatpush3.bf16.msra.mxu1 %v716_v17  ;;  %549 = vlog2.f32 %v45_v29 }
  0x20   :  { %504 = vmatprep.subr.bf16.mxu1 %v718_v18  ;;  %551 = vlog2.f32 %v46_v30 }
  0x23   :  { %512 = vmatpush3.bf16.msra.mxu1 %v722_v19 }
  0x24   :  { %505 = vmatprep.subr.bf16.mxu1 %v724_v20 }
  0x27   :  { %513 = vmatpush3.bf16.msra.mxu1 %v728_v21  ;;  %v546_v31 = vpop.eup %545 }
  0x28   :  { %506 = vmatprep.subr.bf16.mxu1 %v730_v22  ;;  %v548_v32 = vpop.eup %547  ;;  %v48_v33 = vmul.f32 0.6931472, %v546_v31 }
  0x29   :  { %v50_v34 = vmul.f32 0.6931472, %v548_v32  ;;  %v550_v35 = vpop.eup %549 }
  0x2a   :  { %v552_v36 = vpop.eup %551  ;;  %v55_v37 = vmul.f32 0.33333334, %v48_v33  ;;  %v52_v39 = vmul.f32 0.6931472, %v550_v35 }
  0x2b   :  { %v56_v38 = vmul.f32 0.33333334, %v50_v34  ;;  %v54_v40 = vmul.f32 0.6931472, %v552_v36  ;;  %514 = vmatpush3.bf16.msra.mxu1 %v540_v61 }
  0x2c   :  { %v59_v41 = vmul.f32 1.442695, %v55_v37  ;;  %v57_v43 = vmul.f32 0.33333334, %v52_v39  ;;  %507 = vmatprep.subr.bf16.mxu1 %v541_v62 }
  0x2d   :  { %v61_v42 = vmul.f32 1.442695, %v56_v38  ;;  %v58_v44 = vmul.f32 0.33333334, %v54_v40  ;;  %v456_v38 = vld [vmem:[%s780_s5] ss:$0 sm:$0xff] }
  0x2e   :  { %553 = vpow2.f32 %v59_v41  ;;  %v63_v45 = vmul.f32 1.442695, %v57_v43  ;;  %s629_s5 = smov [#allocation5]  }
  0x2f   :  { %555 = vpow2.f32 %v61_v42  ;;  %v65_v46 = vmul.f32 1.442695, %v58_v44  ;;  %515 = vmatpush3.bf16.msra.mxu1 %v542_v63  ;;  %s439_s30 = sshll.u32 %s629_s5, 4  ;;  %s440_s30 = int_to_ptr.vmem [resolvable:$true] %s439_s30 }
  0x30   :  { %557 = vpow2.f32 %v63_v45  ;;  %s599_s7 = scalar_lea.vmem %s440_s30, 512  ;;  %p604_p9 = scmp.lt.s32.totalorder %s440_s30, %s440_s30 }
  0x31   :  { %559 = vpow2.f32 %v65_v46  ;;  %p600_p8 = scmp.ne.s32.totalorder %s440_s30, %s599_s7  ;;  %p605_p10 = scmp.lt.s32.totalorder %s599_s7, %s599_s7 }
  0x33   :  { %p606_p11 = por %p605_p10, %p604_p9 }
  0x35   :  { %p607_p12 = pnand %p606_p11, %p600_p8 }
  0x38   :  { %v554_v49 = vpop.eup %553 }
  0x39   :  { %v556_v50 = vpop.eup %555 }
  0x3a   :  { %v558_v56 = vpop.eup %557 }
  0x3b   :  { %v560_v57 = vpop.eup %559 }
  0x95   :  { %v81_v47 = vpop.permute.xlu0 %80  ;;  %v87_v48 = vpop.permute.xlu1 %86 }
  0x96   :  { %vm91_vm5 = vcmp.eq.s32.totalorder %v81_v47, 1  ;;  %vm93_vm8 = vcmp.eq.s32.totalorder %v87_v48, 1 }
  0x97   :  { %v95_v52 = vsel %vm91_vm5, %v554_v49, %v39_v23  ;;  %v97_v58 = vsel %vm93_vm8, %v558_v56, %v41_v27 }
  0x99   :  { %v84_v51 = vpop.permute.xlu0 %83  ;;  %v90_v54 = vpop.permute.xlu1 %89 }
  0x9a   :  { %vm92_vm6 = vcmp.eq.s32.totalorder %v84_v51, 1  ;;  %vm94_vm9 = vcmp.eq.s32.totalorder %v90_v54, 1 }
  0x9b   :  { %v96_v53 = vsel %vm92_vm6, %v556_v50, %v40_v24  ;;  %v98_v59 = vsel %vm94_vm9, %v560_v57, %v42_v28 }
  0x9c   :  { %v99_v55 = vpack.c.bf16 %v96_v53, %v95_v52  ;;  %v100_v60 = vpack.c.bf16 %v98_v59, %v97_v58 }
  0x9e   :  { %454 = vmatmul.mubr.msk.bf16.vlgmr.msra.gmra.mrb[0].mxu0 %vm123_vm7, %v99_v55 }
  0x9f   :  { %179 = vmatprep.mubr.bf16.mxu0 %v628_v0  ;;  %474 = vmatpush3.bf16.msra.mxu0 %v704_v13  ;;  %v543_v0 = vld [vmem:[#allocation2 + $0x78] sm:$0xff]  }
  0xa0   :  { %475 = vmatprep.subr.bf16.mxu0 %v706_v14  ;;  %508 = vmatprep.subr.bf16.mxu1 %v543_v0 }
  0xa1   :  { %516 = vmatpush3.bf16.msra.mxu1 %v544_v1 }
  0xa3   :  { %476 = vmatpush3.bf16.msra.mxu0 %v710_v15 }
  0xa4   :  { %477 = vmatprep.subr.bf16.mxu0 %v712_v16 }
  0xa6   :  { %455 = vmatmul.mubr.msk.bf16.gmra.mrb[4].mxu0 %vm123_vm7, %v100_v60 }
  0xa7   :  { %478 = vmatpush3.bf16.msra.mxu0 %v716_v17 }
  0xa8   :  { %479 = vmatprep.subr.bf16.mxu0 %v718_v18 }
  0xab   :  { %480 = vmatpush3.bf16.msra.mxu0 %v722_v19 }
  0xac   :  { %481 = vmatprep.subr.bf16.mxu0 %v724_v20 }
  0xaf   :  { %482 = vmatpush3.bf16.msra.mxu0 %v728_v21 }
  0xb0   :  { %483 = vmatprep.subr.bf16.mxu0 %v730_v22 }
  0xb3   :  { %484 = vmatpush3.bf16.msra.mxu0 %v540_v61 }
  0xb4   :  { %485 = vmatprep.subr.bf16.mxu0 %v541_v62 }
  0xb7   :  { %486 = vmatpush3.bf16.msra.mxu0 %v542_v63 }
  0xb8   :  { %487 = vmatprep.subr.bf16.mxu0 %v543_v0 }
  0xbb   :  { %488 = vmatpush3.bf16.msra.mxu0 %v544_v1 }
 0x171   :  { %v171_v9 = vpop.f32.mrb[0].mxu0 }
 0x172   :  { %v172_v10 = vadd.f32 %v171_v9, %v108_v7  ;;  %v173_v11 = vpop.f32.mrb[1].mxu0 }
 0x173   :  { %v174_v12 = vadd.f32 %v173_v11, %v112_v8  ;;  %v175_v13 = vpop.f32.mrb[2].mxu0 }
 0x174   :  { %v176_v14 = vadd.f32 %v175_v13, %v108_v7  ;;  %v177_v15 = vpop.f32.mrb[3].mxu0  ;;  %v190_v17 = vmax.f32 %v172_v10, 0.0 }
 0x175   :  { %v178_v16 = vadd.f32 %v177_v15, %v112_v8  ;;  %v191_v19 = vmax.f32 %v174_v12, 0.0 }
 0x176   :  { %v192_v18 = vmax.f32 %v176_v14, 0.0 }
 0x177   :  { %v193_v20 = vmax.f32 %v178_v16, 0.0 }
 0x178   :  { %v198_v21 = vpack.c.bf16 %v192_v18, %v190_v17 }
 0x179   :  { %v199_v22 = vpack.c.bf16 %v193_v20, %v191_v19  ;;  %v181_v23 = vpop.f32.mrb[4].mxu0 }
 0x17a   :  { %v182_v24 = vadd.f32 %v181_v23, %v108_v7  ;;  %v183_v25 = vpop.f32.mrb[5].mxu0 }
 0x17b   :  { %v184_v26 = vadd.f32 %v183_v25, %v112_v8  ;;  %v185_v27 = vpop.f32.mrb[6].mxu0  ;;  %369 = vmatprep.mubr.bf16.mxu0 %v199_v22 }
 0x17c   :  { %v186_v28 = vadd.f32 %v185_v27, %v108_v7  ;;  %v187_v29 = vpop.f32.mrb[7].mxu0  ;;  %370 = vmatmul.mubr.bf16.vlgmr.msra.gmra.mrb[8].mxu0 %v198_v21  ;;  %v194_v31 = vmax.f32 %v182_v24, 0.0 }
 0x17d   :  { %v188_v30 = vadd.f32 %v187_v29, %v112_v8  ;;  %v195_v33 = vmax.f32 %v184_v26, 0.0 }
 0x17e   :  { %v196_v32 = vmax.f32 %v186_v28, 0.0 }
 0x17f   :  { %v197_v34 = vmax.f32 %v188_v30, 0.0 }
 0x180   :  { %v200_v35 = vpack.c.bf16 %v196_v32, %v194_v31 }
 0x181   :  { %v201_v36 = vpack.c.bf16 %v197_v34, %v195_v33 }
 0x183   :  { %377 = vmatprep.mubr.bf16.mxu1 %v201_v36 }
 0x184   :  { %378 = vmatmul.mubr.bf16.vlgmr.msra.gmra.mrb[0].mxu1 %v200_v35 }
 0x24f   :  { %v489_v37 = vpop.f32.mrb[8].mxu0 }
 0x250   :  { %v490_v39 = vpop.f32.mrb[9].mxu0 }
 0x251   :  { %v491_v40 = vadd.f32 %v490_v39, %v489_v37  ;;  %v492_v41 = vpop.f32.mrb[10].mxu0 }
 0x252   :  { %v493_v42 = vpop.f32.mrb[11].mxu0 }
 0x253   :  { %v372_v43 = vadd.f32 %v491_v40, %v456_v38  ;;  %v494_v44 = vadd.f32 %v493_v42, %v492_v41 }
 0x255   :  { %v375_v45 = vadd.f32 %v494_v44, %v456_v38  ;;  %386 = vmax.xlane.f32.xlu0 %v372_v43 }
 0x257   :  { %v495_v46 = vpop.f32.mrb[0].mxu1  ;;  %388 = vmax.xlane.f32.xlu1 %v375_v45 }
 0x258   :  { %v496_v47 = vpop.f32.mrb[1].mxu1 }
 0x259   :  { %v497_v48 = vadd.f32 %v496_v47, %v495_v46  ;;  %v498_v49 = vpop.f32.mrb[2].mxu1 }
 0x25a   :  { %v499_v50 = vpop.f32.mrb[3].mxu1 }
 0x25b   :  { %v380_v51 = vadd.f32 %v497_v48, %v456_v38  ;;  %v500_v52 = vadd.f32 %v499_v50, %v498_v49 }
 0x25d   :  { %390 = vmax.xlane.f32.xlu0 %v380_v51  ;;  %v383_v53 = vadd.f32 %v500_v52, %v456_v38 }
 0x261   :  { %392 = vmax.xlane.f32.xlu0 %v383_v53 }
 0x2e2   :  { %v387_v54 = vpop.xlane.xlu0 %386 }
 0x2e3   :  { %v394_v55 = vsub.f32 %v372_v43, %v387_v54 }
 0x2e4   :  { %v389_v56 = vpop.xlane.xlu1 %388 }
 0x2e5   :  { %v398_v57 = vmul.f32 1.442695, %v394_v55  ;;  %v395_v58 = vsub.f32 %v375_v45, %v389_v56 }
 0x2e7   :  { %561 = vpow2.f32 %v398_v57  ;;  %v400_v59 = vmul.f32 1.442695, %v395_v58 }
 0x2e9   :  { %563 = vpow2.f32 %v400_v59 }
 0x2ea   :  { %v391_v60 = vpop.xlane.xlu0 %390 }
 0x2eb   :  { %v396_v61 = vsub.f32 %v380_v51, %v391_v60 }
 0x2ed   :  { %v402_v62 = vmul.f32 1.442695, %v396_v61 }
 0x2ee   :  { %v393_v63 = vpop.xlane.xlu0 %392 }
 0x2ef   :  { %565 = vpow2.f32 %v402_v62  ;;  %v397_v0 = vsub.f32 %v383_v53, %v393_v63 }
 0x2f1   :  { %v562_v1 = vpop.eup %561  ;;  %v404_v2 = vmul.f32 1.442695, %v397_v0 }
 0x2f2   :  { %406 = vadd.xlane.f32.xlu1 %v562_v1 }
 0x2f3   :  { %v564_v3 = vpop.eup %563  ;;  %567 = vpow2.f32 %v404_v2 }
 0x2f4   :  { %408 = vadd.xlane.f32.xlu0 %v564_v3 }
 0x2f9   :  { %v566_v4 = vpop.eup %565 }
 0x2fa   :  { %410 = vadd.xlane.f32.xlu1 %v566_v4 }
 0x2fd   :  { %v568_v5 = vpop.eup %567 }
 0x2fe   :  { %412 = vadd.xlane.f32.xlu0 %v568_v5 }
 0x37f   :  { %v407_v6 = vpop.xlane.xlu1 %406 }
 0x380   :  { %569 = vlog2.f32 %v407_v6 }
 0x381   :  { %v409_v7 = vpop.xlane.xlu0 %408 }
 0x382   :  { %571 = vlog2.f32 %v409_v7 }
 0x387   :  { %v411_v8 = vpop.xlane.xlu1 %410 }
 0x388   :  { %573 = vlog2.f32 %v411_v8 }
 0x38a   :  { %v570_v9 = vpop.eup %569 }
 0x38b   :  { %v415_v10 = vmul.f32 0.6931472, %v570_v9  ;;  %v413_v11 = vpop.xlane.xlu0 %412 }
 0x38c   :  { %v572_v12 = vpop.eup %571  ;;  %575 = vlog2.f32 %v413_v11 }
 0x38d   :  { %v422_v13 = vadd.f32 %v415_v10, %v387_v54  ;;  %v417_v14 = vmul.f32 0.6931472, %v572_v12 }
 0x38f   :  { %v426_v15 = vsub.f32 %v372_v43, %v422_v13  ;;  %v423_v16 = vadd.f32 %v417_v14, %v389_v56 }
 0x391   :  { %430 = vst [vmem:[#allocation5] sm:$0xff] %v426_v15  ;;  %v427_v17 = vsub.f32 %v375_v45, %v423_v16 }
 0x392   :  { %v574_v18 = vpop.eup %573 }
 0x393   :  { %431 = vst [vmem:[#allocation5 + $0x8] sm:$0xff] %v427_v17  ;;  %v419_v19 = vmul.f32 0.6931472, %v574_v18 }
 0x395   :  { %v424_v20 = vadd.f32 %v419_v19, %v391_v60 }
 0x396   :  { %v576_v21 = vpop.eup %575 }
 0x397   :  { %v428_v22 = vsub.f32 %v380_v51, %v424_v20  ;;  %v421_v23 = vmul.f32 0.6931472, %v576_v21 }
 0x399   :  { %432 = vst [vmem:[#allocation5 + $0x10] sm:$0xff] %v428_v22  ;;  %v425_v24 = vadd.f32 %v421_v23, %v393_v63 }
 0x39b   :  { %v429_v25 = vsub.f32 %v383_v53, %v425_v24 }
 0x39d   :  { %433 = vst [vmem:[#allocation5 + $0x18] sm:$0xff] %v429_v25 }
 0x39e   :  { %610 = shalt.err (!%p607_p12)
}
 0x39f   :  { %s611_s10 = scalar_lea.hbm %s781_s6, 512 }
 0x3a0   :  { %p612_p13 = scmp.ne.s32.totalorder %s781_s6, %s611_s10  ;;  %p615_p0 = scmp.lt.u32.totalorder %s611_s10, %s781_s6 }
 0x3a2   :  { %p617_p1 = pnand %p615_p0, %p612_p13 }
 0x3a4   :  { %620 = shalt.err (!%p617_p1)
}
 0x3a5   :  { %s630_s15 = smov 128   ;;  %s631_s16 = smov 8  }
 0x3a6   :  { %445 = dma.vmem_to_hbm [thread:$0]  %s440_s30, 512, %s781_s6, [#allocation4], %s630_s15, %s630_s15, %s631_s16  }
 0x3a7   :  { %623 = dma.done.wait [#allocation4], 512  }
 0x3a8   :  { %624 = vsyncadd [#allocation4], 4294966784 }
 0x3a9   :  { %449 = vsyncpa [#allocation3], 1 }
 0x3aa   :  { %450 = vsyncpa [#allocation4], 1 }

</bundles_post_ra>
